<compile_context>
chip_gen: v7x
topology: tpu7x:2x2x1
jax: 0.10.0
libtpu: 0.0.40
codegen_flags: <defaults>
</compile_context>

<pallas_src>
import jax
import jax.numpy as jnp
from jax.experimental import pallas as pl
from jax.experimental.pallas import tpu as pltpu


def _norm_kernel(p_ref, x_ref, o_ref):
    # p_ref: (tR, 2) per-row params [scale, offset]; x_ref / o_ref: (tR, tL).
    p = p_ref[...]
    scale = p[:, 0:1]
    offset = p[:, 1:2]
    o_ref[...] = x_ref[...] * scale - offset


def _round_up(x, m):
    return ((x + m - 1) // m) * m


def _round_down(x, m):
    return (x // m) * m


def _chip_tuning():
    """Return (target block bytes, vmem_limit_bytes or None) per TPU generation."""
    target, vmem_limit = 2 << 20, None  # safe everywhere (v5e: 16 MiB scoped VMEM)
    try:
        kind = jax.devices()[0].device_kind.lower()
    except Exception:
        return target, vmem_limit
    if "v7" in kind or "7x" in kind:
        # 3.2 TB/s HBM: bigger blocks hide the ~0.35us/step pipeline overhead.
        target, vmem_limit = 6 << 20, 48 << 20
    elif "v6" in kind:
        # 4 MiB blocks -> 16 MiB double-buffered, under the 32 MiB default limit.
        target = 4 << 20
    return target, vmem_limit


def _pick_tiles(R, L, itemsize, target_bytes):
    """tR multiple of 8 (or == R), tL multiple of 128 (or == L when L < 128),
    sized so that tR*tL*itemsize ~= target_bytes."""
    target_elems = max(1, target_bytes // itemsize)

    if L < 128:
        tL = L  # full extent is always a legal block dim
    else:
        lane_full = _round_up(L, 128)                # whole-L block, ragged edge masked
        min_rows = 8 if R >= 8 else R
        lane_budget = max(128, _round_down(target_elems // min_rows, 128))
        tL = min(lane_full, lane_budget)

    max_rows = max(1, target_elems // tL)
    if R <= max_rows:
        tR = R                                       # full extent is always legal
    else:
        tR = max(8, _round_down(max_rows, 8))
    return tR, tL


def _ensure_two_steps(tR, tL, R, L):
    """Make sure the grid has >=2 iterations so v7x's 2 TensorCores both get work."""
    if pl.cdiv(R, tR) * pl.cdiv(L, tL) >= 2:
        return tR, tL
    if tR >= 16:
        half = _round_up(-(-tR // 2), 8)
        if pl.cdiv(R, half) >= 2:
            return half, tL
    if tL >= 256:
        half = _round_up(-(-tL // 2), 128)
        if pl.cdiv(L, half) >= 2:
            return tR, half
    return tR, tL


_TINY_BYTES = 512 * 1024    # below this, XLA fusion beats the pallas_call launch cost
_SPLIT_BYTES = 1 * 1024 * 1024


def preprocess(data: jax.Array, mean: jax.Array, std: jax.Array,
               *, force_pallas: bool = False, donate_data: bool = False) -> jax.Array:
    """data: (B, C, H, W) float; mean, std: (C,).  Matches the PyTorch forward."""
    B, C, H, W = data.shape
    assert mean.shape == (C,) and std.shape == (C,)
    dtype = data.dtype
    itemsize = jnp.dtype(dtype).itemsize

    # Folded per-channel affine (exact up to a couple of ulps vs true division).
    scale = (1.0 / (10000.0 * std)).astype(dtype)    # (C,)
    offset = (mean / std).astype(dtype)              # (C,)

    total_bytes = data.size * itemsize
    if not force_pallas and total_bytes < _TINY_BYTES:
        # Tiny input: kernel launch overhead >> data movement; let XLA fuse it.
        return data * scale[None, :, None, None] - offset[None, :, None, None]

    R, L = B * C, H * W
    x2 = data.reshape(R, L)
    params = jnp.tile(jnp.stack([scale, offset], axis=-1), (B, 1))   # (R, 2)

    target_bytes, vmem_limit = _chip_tuning()
    tR, tL = _pick_tiles(R, L, itemsize, target_bytes)
    if total_bytes >= _SPLIT_BYTES:
        tR, tL = _ensure_two_steps(tR, tL, R, L)

    grid = (pl.cdiv(R, tR), pl.cdiv(L, tL))   # lane axis innermost: params stay resident

    out2 = pl.pallas_call(
        _norm_kernel,
        out_shape=jax.ShapeDtypeStruct((R, L), dtype),
        grid=grid,
        in_specs=[
            pl.BlockSpec((tR, 2), lambda i, j: (i, 0)),    # per-row [scale, offset]
            pl.BlockSpec((tR, tL), lambda i, j: (i, j)),   # data tile
        ],
        out_specs=pl.BlockSpec((tR, tL), lambda i, j: (i, j)),
        compiler_params=pltpu.CompilerParams(
            dimension_semantics=("parallel", "parallel"),
            vmem_limit_bytes=vmem_limit,
        ),
        cost_estimate=pl.CostEstimate(
            flops=2 * R * L,
            transcendentals=0,
            bytes_accessed=2 * R * L * itemsize + 2 * R * itemsize,
        ),
        input_output_aliases={1: 0} if donate_data else {},
    )(params, x2)

    return out2.reshape(B, C, H, W)


def preprocess_ref(data, mean, std):
    """Pure-JAX reference matching the PyTorch forward exactly."""
    d = data / 10000.0
    return (d - mean[None, :, None, None]) / std[None, :, None, None]


if __name__ == "__main__":
    B, C, H, W = 2, 4, 16, 16
    key = jax.random.PRNGKey(0)
    k_data, k_mean, k_std = jax.random.split(key, 3)

    # Synthetic millireflectance-like data and deterministic per-channel stats.
    data = jax.random.uniform(
        k_data, (B, C, H, W), dtype=jnp.float32, minval=0.0, maxval=10000.0
    )
    mean = jax.random.uniform(k_mean, (C,), dtype=jnp.float32, minval=0.1, maxval=0.5)
    std = jax.random.uniform(k_std, (C,), dtype=jnp.float32, minval=0.05, maxval=0.3)

    ref = preprocess_ref(data, mean, std)

    # Force the Pallas path (this small test case would otherwise take the
    # tiny-input XLA-fusion fast path).
    out = jax.block_until_ready(preprocess(data, mean, std, force_pallas=True))
    assert out.shape == (B, C, H, W)
    assert out.dtype == jnp.float32
    assert jnp.allclose(out, ref, rtol=1e-5, atol=1e-5)

    # Auto-dispatch path (tiny input -> fused jnp) must match too.
    out_auto = jax.block_until_ready(preprocess(data, mean, std))
    assert jnp.allclose(out_auto, ref, rtol=1e-5, atol=1e-5)

    print("KERNEL_OK")
</pallas_src>

<mosaic_0001>
module attributes {stable_mosaic.version = 11 : i64} {
  func.func @_norm_kernel(%arg0: i32, %arg1: i32, %arg2: memref<8x2xf32, #tpu.memory_space<vmem>>, %arg3: memref<8x256xf32, #tpu.memory_space<vmem>>, %arg4: memref<8x256xf32, #tpu.memory_space<vmem>>) attributes {dimension_semantics = [#tpu.dimension_semantics<parallel>, #tpu.dimension_semantics<parallel>], iteration_bounds = array<i64: 1, 1>, scalar_prefetch = 0 : i64, scratch_operands = 0 : i64, tpu.core_type = #tpu.core_type<tc>, window_params = [{transform_indices = @transform_0, window_bounds = array<i64: 8, 2>}, {transform_indices = @transform_1, window_bounds = array<i64: 8, 256>}, {transform_indices = @transform_2, window_bounds = array<i64: 8, 256>}]} {
    %c0 = arith.constant 0 : index
    %c0_0 = arith.constant 0 : index
    %0 = vector.load %arg2[%c0, %c0_0] : memref<8x2xf32, #tpu.memory_space<vmem>>, vector<8x2xf32>
    %1 = vector.extract_strided_slice %0 {offsets = [0, 0], sizes = [8, 1], strides = [1, 1]} : vector<8x2xf32> to vector<8x1xf32>
    %2 = vector.extract_strided_slice %0 {offsets = [0, 1], sizes = [8, 1], strides = [1, 1]} : vector<8x2xf32> to vector<8x1xf32>
    %c0_1 = arith.constant 0 : index
    %c0_2 = arith.constant 0 : index
    %3 = vector.load %arg3[%c0_1, %c0_2] : memref<8x256xf32, #tpu.memory_space<vmem>>, vector<8x256xf32>
    %4 = vector.broadcast %1 : vector<8x1xf32> to vector<8x256xf32>
    %5 = arith.mulf %3, %4 : vector<8x256xf32>
    %6 = vector.broadcast %2 : vector<8x1xf32> to vector<8x256xf32>
    %7 = arith.subf %5, %6 : vector<8x256xf32>
    %c0_3 = arith.constant 0 : index
    %c0_4 = arith.constant 0 : index
    %8 = vector.load %arg4[%c0_3, %c0_4] : memref<8x256xf32, #tpu.memory_space<vmem>>, vector<8x256xf32>
    tpu.vector_store %arg4[%c0_3, %c0_4], %7 {strides = array<i32>} : memref<8x256xf32, #tpu.memory_space<vmem>>, vector<8x256xf32>,
    return
  }
  func.func @transform_0(%arg0: i32, %arg1: i32) -> (i32, i32) {
    %c0_i32 = arith.constant 0 : i32
    %c0_i32_0 = arith.constant 0 : i32
    return %arg0, %c0_i32 : i32, i32
  }
  func.func @transform_1(%arg0: i32, %arg1: i32) -> (i32, i32) {
    %c0_i32 = arith.constant 0 : i32
    return %arg0, %arg1 : i32, i32
  }
  func.func @transform_2(%arg0: i32, %arg1: i32) -> (i32, i32) {
    %c0_i32 = arith.constant 0 : i32
    return %arg0, %arg1 : i32, i32
  }
}

</mosaic_0001>

<bundles_post_ra>
// kernel: tpu_custom_call.1
= control target key start
LH: loop header
LB: loop body
LE: loop exit
PB: predicated region body
PF: predicated region fallthrough
CT: control target
= control target key end

     0   :  { %7 = vsyncpa [#allocation3], 0  ;;  %s157_s0 = inlined_call_operand.vmem [shape: f32[8,2], index: 0, kind: input, shape index: {}]   ;;  %s158_s1 = inlined_call_operand.hbm [shape: f32[8,256], index: 1, kind: input, shape index: {}]   ;;  %s159_s2 = inlined_call_operand.hbm [shape: f32[8,256], index: 2, kind: output, shape index: {}]  }
   0x1   :  { %8 = vsyncpa [#allocation4], 0  ;;  %s111_s9 = smov [#allocation2]   ;;  %s63_s13 = scalar_lea.hbm %s158_s1, 256 }
   0x2   :  { %s17_s10 = sshll.u32 %s111_s9, 4  ;;  %p64_p0 = scmp.ne.s32.totalorder %s158_s1, %s63_s13  ;;  %s18_s10 = int_to_ptr.vmem [resolvable:$true] %s17_s10 }
   0x3   :  { %p67_p1 = scmp.lt.u32.totalorder %s63_s13, %s158_s1 }
   0x5   :  { %p69_p2 = pnand %p67_p1, %p64_p0 }
   0x7   :  { %72 = shalt.err (!%p69_p2)
}
   0x8   :  { %s73_s18 = scalar_lea.vmem %s18_s10, 256  ;;  %p78_p4 = scmp.lt.s32.totalorder %s18_s10, %s18_s10 }
   0x9   :  { %p74_p3 = scmp.ne.s32.totalorder %s18_s10, %s73_s18  ;;  %p79_p5 = scmp.lt.s32.totalorder %s73_s18, %s73_s18 }
   0xb   :  { %p80_p6 = por %p79_p5, %p78_p4 }
   0xd   :  { %p81_p7 = pnand %p80_p6, %p74_p3 }
   0xf   :  { %84 = shalt.err (!%p81_p7)
}
  0x10   :  { %20 = dma.hbm_to_vmem [thread:$0]  %s158_s1, 256, %s18_s10, [#allocation3]  }
  0x11   :  { %107 = dma.done.wait [#allocation3], 256  }
  0x12   :  { %108 = vsyncadd [#allocation3], 4294967040  ;;  %v112_v0 = vmov 0   ;;  %v24_v1 = vld [vmem:[%s157_s0] sm:$0xff]  ;;  %v113_v2 = vmov 1   ;;  %v26_v5 = vld [vmem:[#allocation2 + $0x8] sm:$0xff] }
  0x13   :  { %61 = vset.pattern.permute.xlu0 %v112_v0  ;;  %v25_v4 = vld [vmem:[#allocation2] sm:$0xff]  ;;  %s114_s23 = smov [#allocation5]  }
  0x14   :  { %29 = vperm.xlu0 %61, %v24_v1   ;;  %s48_s24 = sshll.u32 %s114_s23, 4  ;;  %s49_s24 = int_to_ptr.vmem [resolvable:$true] %s48_s24 }
  0x15   :  { %s85_s1 = scalar_lea.vmem %s49_s24, 256  ;;  %p90_p9 = scmp.lt.s32.totalorder %s49_s24, %s49_s24 }
  0x16   :  { %p86_p8 = scmp.ne.s32.totalorder %s49_s24, %s85_s1  ;;  %p91_p10 = scmp.lt.s32.totalorder %s85_s1, %s85_s1 }
  0x18   :  { %62 = vset.pattern.permute.xlu0 %v113_v2  ;;  %p92_p11 = por %p91_p10, %p90_p9 }
  0x19   :  { %35 = vperm.xlu0 %62, %v24_v1  }
  0x1a   :  { %p93_p12 = pnand %p92_p11, %p86_p8 }
  0x93   :  { %v30_v3 = vpop.permute.xlu0 %29 }
  0x94   :  { %v32_v6 = vmul.f32 %v30_v3, %v25_v4  ;;  %v33_v7 = vmul.f32 %v30_v3, %v26_v5 }
  0x98   :  { %v36_v8 = vpop.permute.xlu0 %35 }
  0x99   :  { %v38_v9 = vsub.f32 %v32_v6, %v36_v8  ;;  %v39_v10 = vsub.f32 %v33_v7, %v36_v8 }
  0x9b   :  { %40 = vst [vmem:[#allocation5] sm:$0xff] %v38_v9  ;;  %41 = vst [vmem:[#allocation5 + $0x8] sm:$0xff] %v39_v10 }
  0x9c   :  { %96 = shalt.err (!%p93_p12)
}
  0x9d   :  { %s97_s26 = scalar_lea.hbm %s159_s2, 256 }
  0x9e   :  { %p98_p13 = scmp.ne.s32.totalorder %s159_s2, %s97_s26  ;;  %p101_p0 = scmp.lt.u32.totalorder %s97_s26, %s159_s2 }
  0xa0   :  { %p103_p1 = pnand %p101_p0, %p98_p13 }
  0xa2   :  { %106 = shalt.err (!%p103_p1)
}
  0xa3   :  { %51 = dma.vmem_to_hbm [thread:$0]  %s49_s24, 256, %s159_s2, [#allocation4]  }
  0xa4   :  { %109 = dma.done.wait [#allocation4], 256  }
  0xa5   :  { %110 = vsyncadd [#allocation4], 4294967040 }
  0xa6   :  { %55 = vsyncpa [#allocation3], 1 }
  0xa7   :  { %56 = vsyncpa [#allocation4], 1 }

</bundles_post_ra>
